<compile_context>
chip_gen: v7x
topology: tpu7x:2x2x1
jax: 0.10.0
libtpu: 0.0.40
codegen_flags: <defaults>
</compile_context>

<pallas_src>
import jax
import jax.numpy as jnp
from jax.experimental import pallas as pl
from jax.experimental.pallas import tpu as pltpu


# ----------------------------------------------------------------------------
# Kernels
# ----------------------------------------------------------------------------
def _mlp_kernel_direct(x_ref, w1_ref, b1_ref, w2_ref, b2_ref, o_ref):
    """f32 output: accumulate straight into the resident output block."""
    j = pl.program_id(1)

    @pl.when(j == 0)
    def _init():
        o_ref[...] = jnp.zeros_like(o_ref)

    h = jnp.dot(x_ref[...], w1_ref[...], preferred_element_type=jnp.float32)
    h = jnp.maximum(h + b1_ref[...].astype(jnp.float32), 0.0)
    # TODO(synk): nn.Dropout omitted (inference / identity semantics).
    o_ref[...] += jnp.dot(h.astype(w2_ref.dtype), w2_ref[...],
                          preferred_element_type=jnp.float32)

    @pl.when(j == pl.num_programs(1) - 1)
    def _finalize():
        o_ref[...] += b2_ref[...].astype(jnp.float32)


def _mlp_kernel_scratch(x_ref, w1_ref, b1_ref, w2_ref, b2_ref, o_ref, acc_ref):
    """Non-f32 output: f32 VMEM accumulator with init/finalize."""
    j = pl.program_id(1)

    @pl.when(j == 0)
    def _init():
        acc_ref[...] = jnp.zeros_like(acc_ref)

    h = jnp.dot(x_ref[...], w1_ref[...], preferred_element_type=jnp.float32)
    h = jnp.maximum(h + b1_ref[...].astype(jnp.float32), 0.0)
    # TODO(synk): nn.Dropout omitted (inference / identity semantics).
    acc_ref[...] += jnp.dot(h.astype(w2_ref.dtype), w2_ref[...],
                            preferred_element_type=jnp.float32)

    @pl.when(j == pl.num_programs(1) - 1)
    def _finalize():
        o_ref[...] = (acc_ref[...] + b2_ref[...].astype(jnp.float32)).astype(o_ref.dtype)


# ----------------------------------------------------------------------------
# Wrapper
# ----------------------------------------------------------------------------
_ROW_ALIGN = 16     # sublane-safe for f32 and bf16 tiles
_LANE = 128


def _round_up(x, m):
    return ((x + m - 1) // m) * m


def _pad2(a, rows, cols):
    pr, pc = rows - a.shape[0], cols - a.shape[1]
    return jnp.pad(a, ((0, pr), (0, pc))) if (pr or pc) else a


def _vmem_budget_bytes():
    try:
        cap = int(pltpu.get_tpu_info().vmem_capacity_bytes)
    except Exception:
        cap = 64 << 20  # conservative fallback = v7x per-TensorCore VMEM
    return (cap * 3) // 4


def mlp_forward(x, w1, b1, w2, b2, *, tm=256, tf=512, compute_dtype=jnp.bfloat16):
    """Fused MLP: relu(x @ w1 + b1) @ w2 + b2 (dropout = identity).

    x: (..., D), w1: (D, F), b1: (F,), w2: (F, D), b2: (D,).
    """
    orig_shape = x.shape
    D, F = w1.shape
    assert w2.shape == (F, D) and b1.shape == (F,) and b2.shape == (D,)
    M = x.size // D

    out_dtype = x.dtype
    out_bytes = jnp.dtype(out_dtype).itemsize
    cdtype = jnp.dtype(compute_dtype) if compute_dtype is not None else jnp.dtype(x.dtype)
    cbytes = cdtype.itemsize

    # Lane-dense D / F (padded with zeros -> math unchanged).
    D_pad = _round_up(D, _LANE)

    # Row tile: <= tm, >= 2 row blocks when possible (v7x megacore gets both TCs).
    tm = max(_ROW_ALIGN, min(tm, _round_up(M, _ROW_ALIGN)))
    if _round_up(M, tm) // tm < 2 and M > _ROW_ALIGN:
        tm = _round_up(-(-M // 2), _ROW_ALIGN)

    # Hidden tile: multiple of 128, <= padded F.
    tf = max(_LANE, min(_round_up(tf, _LANE), _round_up(F, _LANE)))

    # Shrink tiles until the double-buffered footprint fits the VMEM budget.
    budget = _vmem_budget_bytes()
    use_direct = out_dtype == jnp.float32

    def footprint(tm_, tf_):
        tiles = (tm_ * D_pad * cbytes        # x row tile
                 + D_pad * tf_ * cbytes      # W1 tile
                 + tf_ * 4                   # b1 tile (f32)
                 + tf_ * D_pad * cbytes      # W2 tile
                 + D_pad * 4                 # b2 (f32)
                 + tm_ * D_pad * out_bytes)  # output block
        scratch = 0 if use_direct else tm_ * D_pad * 4
        return 2 * tiles + scratch           # BlockSpec double-buffering

    while footprint(tm, tf) > budget and tf > _LANE:
        tf = max(_LANE, (tf // 2) // _LANE * _LANE)
    while footprint(tm, tf) > budget and tm > _ROW_ALIGN:
        tm = max(_ROW_ALIGN, (tm // 2) // _ROW_ALIGN * _ROW_ALIGN)

    M_pad = _round_up(M, tm)
    F_pad = _round_up(F, tf)
    grid_m, grid_f = M_pad // tm, F_pad // tf

    # Pad (zeros) and cast matmul operands to the compute dtype; biases stay f32.
    x2 = x.reshape(M, D)
    xp = _pad2(x2, M_pad, D_pad).astype(cdtype)
    w1p = _pad2(w1, D_pad, F_pad).astype(cdtype)
    w2p = _pad2(w2, F_pad, D_pad).astype(cdtype)
    b1p = _pad2(b1.reshape(1, F), 1, F_pad).astype(jnp.float32)
    b2p = _pad2(b2.reshape(1, D), 1, D_pad).astype(jnp.float32)

    # Cost estimate: W1/W2 (and biases) are re-streamed once per row tile.
    flops = 4 * M_pad * D_pad * F_pad
    bytes_accessed = (M_pad * D_pad * cbytes
                      + M_pad * D_pad * out_bytes
                      + grid_m * (D_pad * F_pad * cbytes
                                  + F_pad * D_pad * cbytes
                                  + F_pad * 4 + D_pad * 4))

    kernel = _mlp_kernel_direct if use_direct else _mlp_kernel_scratch
    scratch_shapes = [] if use_direct else [pltpu.VMEM((tm, D_pad), jnp.float32)]

    out = pl.pallas_call(
        kernel,
        out_shape=jax.ShapeDtypeStruct((M_pad, D_pad), out_dtype),
        grid_spec=pltpu.PrefetchScalarGridSpec(
            num_scalar_prefetch=0,
            grid=(grid_m, grid_f),
            in_specs=[
                pl.BlockSpec((tm, D_pad), lambda i, j: (i, 0)),   # x (resident over j)
                pl.BlockSpec((D_pad, tf), lambda i, j: (0, j)),   # W1 column tile
                pl.BlockSpec((1, tf), lambda i, j: (0, j)),       # b1 tile
                pl.BlockSpec((tf, D_pad), lambda i, j: (j, 0)),   # W2 row tile
                pl.BlockSpec((1, D_pad), lambda i, j: (0, 0)),    # b2 (resident)
            ],
            out_specs=pl.BlockSpec((tm, D_pad), lambda i, j: (i, 0)),
            scratch_shapes=scratch_shapes,
        ),
        compiler_params=pltpu.CompilerParams(
            dimension_semantics=("parallel", "arbitrary"),
            vmem_limit_bytes=budget,
        ),
        cost_estimate=pl.CostEstimate(
            flops=flops, transcendentals=0, bytes_accessed=bytes_accessed),
    )(xp, w1p, b1p, w2p, b2p)

    return out[:M, :D].reshape(orig_shape)


# ----------------------------------------------------------------------------
# Deterministic parameter init (torch.nn.Linear math with (in, out) layout)
# ----------------------------------------------------------------------------
def init_params(key, model_depth, ff_depth):
    k1, k2, k3, k4 = jax.random.split(key, 4)
    w1 = jax.random.normal(k1, (model_depth, ff_depth), jnp.float32) * 0.05
    b1 = jax.random.normal(k2, (ff_depth,), jnp.float32) * 0.01
    w2 = jax.random.normal(k3, (ff_depth, model_depth), jnp.float32) * 0.05
    b2 = jax.random.normal(k4, (model_depth,), jnp.float32) * 0.01
    return w1, b1, w2, b2


# ----------------------------------------------------------------------------
if __name__ == "__main__":
    B, S, model_depth, ff_depth = 2, 16, 32, 64

    key = jax.random.PRNGKey(0)
    k_param, k_x = jax.random.split(key)

    w1, b1, w2, b2 = init_params(k_param, model_depth, ff_depth)
    x = jax.random.normal(k_x, (B, S, model_depth), jnp.float32)

    fwd = jax.jit(mlp_forward)
    out = fwd(x, w1, b1, w2, b2)
    jax.block_until_ready(out)
    assert out.shape == (B, S, model_depth)

    # Reference with matching bf16-matmul / f32-accumulate math.
    xb, w1b, w2b = (a.astype(jnp.bfloat16) for a in (x, w1, w2))
    h = jnp.maximum(
        jnp.dot(xb.reshape(-1, model_depth), w1b,
                preferred_element_type=jnp.float32) + b1, 0.0)
    ref = (jnp.dot(h.astype(jnp.bfloat16), w2b,
                   preferred_element_type=jnp.float32) + b2).reshape(B, S, model_depth)
    err = float(jnp.max(jnp.abs(out - ref)))
    assert jnp.allclose(out, ref, atol=2e-2, rtol=2e-2), err

    print("KERNEL_OK")
</pallas_src>

<mosaic_0001>
module attributes {stable_mosaic.version = 11 : i64} {
  func.func @_mlp_kernel_direct(%arg0: i32, %arg1: i32, %arg2: memref<16x128xbf16, #tpu.memory_space<vmem>>, %arg3: memref<128x128xbf16, #tpu.memory_space<vmem>>, %arg4: memref<1x128xf32, #tpu.memory_space<vmem>>, %arg5: memref<128x128xbf16, #tpu.memory_space<vmem>>, %arg6: memref<1x128xf32, #tpu.memory_space<vmem>>, %arg7: memref<16x128xf32, #tpu.memory_space<vmem>>) attributes {dimension_semantics = [#tpu.dimension_semantics<parallel>, #tpu.dimension_semantics<arbitrary>], iteration_bounds = array<i64: 2, 1>, scalar_prefetch = 0 : i64, scratch_operands = 0 : i64, tpu.core_type = #tpu.core_type<tc>, window_params = [{transform_indices = @transform_0, window_bounds = array<i64: 16, 128>}, {transform_indices = @transform_1, window_bounds = array<i64: 128, 128>}, {transform_indices = @transform_2, window_bounds = array<i64: 1, 128>}, {transform_indices = @transform_3, window_bounds = array<i64: 128, 128>}, {pipeline_mode = #tpu.pipeline_mode<synchronous>, transform_indices = @transform_4, window_bounds = array<i64: 1, 128>}, {transform_indices = @transform_5, window_bounds = array<i64: 16, 128>}]} {
    %c0_i32 = arith.constant 0 : i32
    %0 = arith.cmpi eq, %arg1, %c0_i32 : i32
    %1 = arith.extui %0 : i1 to i32
    %c0_i32_0 = arith.constant 0 : i32
    %2 = arith.cmpi ne, %1, %c0_i32_0 : i32
    scf.if %2 {
      %cst_16 = arith.constant 0.000000e+00 : f32
      %20 = vector.broadcast %cst_16 : f32 to vector<16x128xf32>
      %c0_17 = arith.constant 0 : index
      %c0_18 = arith.constant 0 : index
      %21 = vector.load %arg7[%c0_17, %c0_18] : memref<16x128xf32, #tpu.memory_space<vmem>>, vector<16x128xf32>
      tpu.vector_store %arg7[%c0_17, %c0_18], %20 {strides = array<i32>} : memref<16x128xf32, #tpu.memory_space<vmem>>, vector<16x128xf32>,
    } else {
    }
    %c0 = arith.constant 0 : index
    %c0_1 = arith.constant 0 : index
    %3 = vector.load %arg2[%c0, %c0_1] : memref<16x128xbf16, #tpu.memory_space<vmem>>, vector<16x128xbf16>
    %c0_2 = arith.constant 0 : index
    %c0_3 = arith.constant 0 : index
    %4 = vector.load %arg3[%c0_2, %c0_3] : memref<128x128xbf16, #tpu.memory_space<vmem>>, vector<128x128xbf16>
    %cst = arith.constant dense<0.000000e+00> : vector<16x128xf32>
    %5 = tpu.matmul %3, %4, %cst {dimension_numbers = #tpu.dot_dimension_numbers<[1], [0], [0], [1], [0, 0, 1, 1], [], []>} : vector<16x128xbf16>, vector<128x128xbf16>, vector<16x128xf32> -> vector<16x128xf32>
    %c0_4 = arith.constant 0 : index
    %c0_5 = arith.constant 0 : index
    %6 = vector.load %arg4[%c0_4, %c0_5] : memref<1x128xf32, #tpu.memory_space<vmem>>, vector<1x128xf32>
    %7 = vector.broadcast %6 : vector<1x128xf32> to vector<16x128xf32>
    %8 = arith.addf %5, %7 : vector<16x128xf32>
    %cst_6 = arith.constant 0.000000e+00 : f32
    %9 = vector.broadcast %cst_6 : f32 to vector<16x128xf32>
    %10 = arith.maximumf %8, %9 : vector<16x128xf32>
    %c0_7 = arith.constant 0 : index
    %c0_8 = arith.constant 0 : index
    %11 = vector.load %arg7[%c0_7, %c0_8] : memref<16x128xf32, #tpu.memory_space<vmem>>, vector<16x128xf32>
    %12 = arith.truncf %10 : vector<16x128xf32> to vector<16x128xbf16>
    %c0_9 = arith.constant 0 : index
    %c0_10 = arith.constant 0 : index
    %13 = vector.load %arg5[%c0_9, %c0_10] : memref<128x128xbf16, #tpu.memory_space<vmem>>, vector<128x128xbf16>
    %cst_11 = arith.constant dense<0.000000e+00> : vector<16x128xf32>
    %14 = tpu.matmul %12, %13, %cst_11 {dimension_numbers = #tpu.dot_dimension_numbers<[1], [0], [0], [1], [0, 0, 1, 1], [], []>} : vector<16x128xbf16>, vector<128x128xbf16>, vector<16x128xf32> -> vector<16x128xf32>
    %15 = arith.addf %11, %14 : vector<16x128xf32>
    %c0_12 = arith.constant 0 : index
    %c0_13 = arith.constant 0 : index
    %16 = vector.load %arg7[%c0_12, %c0_13] : memref<16x128xf32, #tpu.memory_space<vmem>>, vector<16x128xf32>
    tpu.vector_store %arg7[%c0_12, %c0_13], %15 {strides = array<i32>} : memref<16x128xf32, #tpu.memory_space<vmem>>, vector<16x128xf32>,
    %c0_i32_14 = arith.constant 0 : i32
    %17 = arith.cmpi eq, %arg1, %c0_i32_14 : i32
    %18 = arith.extui %17 : i1 to i32
    %c0_i32_15 = arith.constant 0 : i32
    %19 = arith.cmpi ne, %18, %c0_i32_15 : i32
    scf.if %19 {
      %c0_16 = arith.constant 0 : index
      %c0_17 = arith.constant 0 : index
      %20 = vector.load %arg7[%c0_16, %c0_17] : memref<16x128xf32, #tpu.memory_space<vmem>>, vector<16x128xf32>
      %c0_18 = arith.constant 0 : index
      %c0_19 = arith.constant 0 : index
      %21 = vector.load %arg6[%c0_18, %c0_19] : memref<1x128xf32, #tpu.memory_space<vmem>>, vector<1x128xf32>
      %22 = vector.broadcast %21 : vector<1x128xf32> to vector<16x128xf32>
      %23 = arith.addf %20, %22 : vector<16x128xf32>
      %c0_20 = arith.constant 0 : index
      %c0_21 = arith.constant 0 : index
      %24 = vector.load %arg7[%c0_20, %c0_21] : memref<16x128xf32, #tpu.memory_space<vmem>>, vector<16x128xf32>
      tpu.vector_store %arg7[%c0_20, %c0_21], %23 {strides = array<i32>} : memref<16x128xf32, #tpu.memory_space<vmem>>, vector<16x128xf32>,
    } else {
    }
    return
  }
  func.func @transform_0(%arg0: i32, %arg1: i32) -> (i32, i32) {
    %c0_i32 = arith.constant 0 : i32
    %c0_i32_0 = arith.constant 0 : i32
    return %arg0, %c0_i32 : i32, i32
  }
  func.func @transform_1(%arg0: i32, %arg1: i32) -> (i32, i32) {
    %c0_i32 = arith.constant 0 : i32
    %c0_i32_0 = arith.constant 0 : i32
    return %c0_i32, %arg1 : i32, i32
  }
  func.func @transform_2(%arg0: i32, %arg1: i32) -> (i32, i32) {
    %c0_i32 = arith.constant 0 : i32
    %c0_i32_0 = arith.constant 0 : i32
    return %c0_i32, %arg1 : i32, i32
  }
  func.func @transform_3(%arg0: i32, %arg1: i32) -> (i32, i32) {
    %c0_i32 = arith.constant 0 : i32
    %c0_i32_0 = arith.constant 0 : i32
    return %arg1, %c0_i32 : i32, i32
  }
  func.func @transform_4(%arg0: i32, %arg1: i32) -> (i32, i32) {
    %c0_i32 = arith.constant 0 : i32
    %c0_i32_0 = arith.constant 0 : i32
    %c0_i32_1 = arith.constant 0 : i32
    return %c0_i32, %c0_i32_0 : i32, i32
  }
  func.func @transform_5(%arg0: i32, %arg1: i32) -> (i32, i32) {
    %c0_i32 = arith.constant 0 : i32
    %c0_i32_0 = arith.constant 0 : i32
    return %arg0, %c0_i32 : i32, i32
  }
}

</mosaic_0001>

<bundles_post_ra>
// kernel: mlp_forward.1
= control target key start
LH: loop header
LB: loop body
LE: loop exit
PB: predicated region body
PF: predicated region fallthrough
CT: control target
= control target key end

     0   :  { %10 = vsyncpa [#allocation3], 0  ;;  %s1130_s0 = inlined_call_operand.vmem [shape: bf16[32,128], index: 0, kind: input, shape index: {}]   ;;  %s1131_s1 = inlined_call_operand.vmem [shape: bf16[128,128], index: 1, kind: input, shape index: {}]   ;;  %s1132_s2 = inlined_call_operand.vmem [shape: f32[1,128], index: 2, kind: input, shape index: {}]   ;;  %s1133_s3 = inlined_call_operand.vmem [shape: bf16[128,128], index: 3, kind: input, shape index: {}]   ;;  %s1134_s4 = inlined_call_operand.vmem [shape: f32[1,128], index: 4, kind: input, shape index: {}]   ;;  %s1135_s5 = inlined_call_operand.hbm [shape: f32[32,128], index: 5, kind: output, shape index: {}]  }
   0x1   :  { %12 = vsyncpa [#allocation3 + $0x1], 0  ;;  %s959_s18 = smov 0   ;;  %s961_s19 = smov 0  }
   0x2   :  { %s963_s20 = smov 0   ;;  %s965_s21 = smov 0  }
   0x3   :  { %s967_s22 = smov 0   ;;  %s969_s23 = smov 0  }
   0x4 LB: > { %s674_s24 = sadd.s32 4294967295, %s922_s23   ;;  %s675_s25 = sadd.s32 4294967294, %s922_s23   ;;  %s922_s23 = sphi %s969_s23, %s18_s23   ;;  %s918_s22 = sphi %s967_s22, %s1142_s22   ;;  %s914_s21 = sphi %s965_s21, %s1141_s21   ;;  %s910_s20 = sphi %s963_s20, %s1140_s20   ;;  %s906_s19 = sphi %s961_s19, %s1139_s19   ;;  %s902_s18 = sphi %s959_s18, %s1138_s18  }
   0x5   : > { %s30_s26 = sadd.s32 1, %s918_s22  ;;  %s162_s27 = sadd.s32 1, %s910_s20 }
   0x6   : > { %p32_p0 = scmp.ge.s32.totalorder %s30_s26, 2  ;;  %p172_p1 = scmp.ne.s32.totalorder %s910_s20, %s906_s19 }
   0x7   : > { %p173_p2 = scmp.eq.s32.totalorder %s674_s24, 1  ;;  %p178_p3 = scmp.ne.s32.totalorder %s906_s19, %s902_s18 }
   0x8   : > { %s1144_s26 = smov (%p32_p0, %s30_s26), 0  ;;  %p179_p5 = scmp.eq.s32.totalorder %s675_s25, 1 }
   0x9   : > { %p999_p4 = por %p173_p2, %p172_p1  ;;  %s159_s29 = ssub.s32 %s918_s22, %s1144_s26 }
   0xa   : > { %p681_p6 = scmp.ge.s32.totalorder %s922_s23, 1  ;;  %p160_p7 = scmp.eq.s32.totalorder %s159_s29, 0 }
   0xb   : > { %p1006_p8 = por %p179_p5, %p178_p3  ;;  %p231_p9 = scmp.lt.s32.totalorder %s922_s23, 3 }
   0xc   : > { %s1012_s6 = scalar_select %p160_p7, %s910_s20, %s162_s27  }
   0xd   : > { %p232_p10 = pnand %p681_p6, %p231_p9 }
   0xe   : > { %v827_v0 = vld [vmem:[%s1131_s1] sm:$0xff] (!%p232_p10)   ;;  %v924_v1 = vmov (!%p232_p10), 0.0   ;;  %v828_v2 = vld [vmem:[%s1131_s1 + $0x8] sm:$0xff] (!%p232_p10)   ;;  %vm925_vm0 = vmmov (!%p232_p10), 0   ;;  %s683_s11 = sshll.u32 (!%p232_p10), %s914_s21, 1  ;;  %v829_v3 = vld [vmem:[%s1131_s1 + $0x10] sm:$0xff] (!%p232_p10)  }
   0xf   : > { %235 = sbr.rel (%p232_p10) target bundleno = 498 (0x1f2), region = 40  ;;  %728 = vmatprep.subr.bf16.mxu0 (!%p232_p10), %v924_v1  ;;  %748 = vmatprep.subr.bf16.mxu1 (!%p232_p10), %v924_v1  ;;  %p272_p11 = scmp.lt.s32.totalorder (!%p232_p10), %s683_s11, 3  ;;  %v836_v4 = vld [vmem:[%s1133_s3] sm:$0xff] (!%p232_p10)   ;;  %v830_v5 = vld [vmem:[%s1131_s1 + $0x18] sm:$0xff] (!%p232_p10)   ;;  %v837_v6 = vld [vmem:[%s1133_s3 + $0x8] sm:$0xff] (!%p232_p10)  }
  0x10   : > { %729 = vmatpush3.bf16.msra.mxu0 (!%p232_p10), %v827_v0  ;;  %744 = vmatprep.mubr.msk.bf16.mxu0 (!%p232_p10), %vm925_vm0, %v924_v1  ;;  %v831_v7 = vld [vmem:[%s1131_s1 + $0x20] sm:$0xff] (!%p232_p10)   ;;  %v838_v8 = vld [vmem:[%s1133_s3 + $0x10] sm:$0xff] (!%p232_p10)   ;;  %v832_v9 = vld [vmem:[%s1131_s1 + $0x28] sm:$0xff] (!%p232_p10)   ;;  %s709_s29 = sshll.u32 (!%p232_p10), %s914_s21, 8  ;;  %s926_s13 = smov (!%p232_p10), [#allocation2]  }
  0x11   : > { %730 = vmatprep.subr.bf16.mxu0 (!%p232_p10), %v924_v1  ;;  %764 = vmatprep.mubr.msk.bf16.mxu1 (!%p232_p10), %vm925_vm0, %v924_v1  ;;  %v839_v10 = vld [vmem:[%s1133_s3 + $0x18] sm:$0xff] (!%p232_p10)   ;;  %v833_v11 = vld [vmem:[%s1131_s1 + $0x30] sm:$0xff] (!%p232_p10)   ;;  %v840_v12 = vld [vmem:[%s1133_s3 + $0x20] sm:$0xff] (!%p232_p10)  }
  0x12   : > { %749 = vmatpush3.bf16.msra.mxu1 (!%p232_p10), %v836_v4  ;;  %v834_v13 = vld [vmem:[%s1131_s1 + $0x38] sm:$0xff] (!%p232_p10)   ;;  %v841_v14 = vld [vmem:[%s1133_s3 + $0x28] sm:$0xff] (!%p232_p10)   ;;  %v842_v16 = vld [vmem:[%s1133_s3 + $0x30] sm:$0xff] (!%p232_p10)  }
  0x13   : > { %750 = vmatprep.subr.bf16.mxu1 (!%p232_p10), %v924_v1  ;;  %v843_v17 = vld [vmem:[%s1133_s3 + $0x38] sm:$0xff] (!%p232_p10)   ;;  %v685_v18 = vld [vmem:[%s1132_s2] ss:$0 sm:$0xff] (!%p232_p10) }
  0x14   : > { %731 = vmatpush3.bf16.msra.mxu0 (!%p232_p10), %v828_v2  ;;  %v703_v29 = vld [vmem:[%s1134_s4] ss:$0 sm:$0xff] (!%p232_p10) }
  0x15   : > { %732 = vmatprep.subr.bf16.mxu0 (!%p232_p10), %v924_v1 }
  0x16   : > { %s1146_s11 = smov (!%p272_p11, %s683_s11), 3  ;;  %751 = vmatpush3.bf16.msra.mxu1 %v837_v6 }
  0x17   : > { %s684_s14 = sshll.u32 %s1146_s11, 2  ;;  %752 = vmatprep.subr.bf16.mxu1 %v924_v1  ;;  %s1080_s11 = scalar_lea.hbm %s1135_s5, %s709_s29 }
  0x18   : > { %s1027_s17 = scalar_lea.vmem %s1130_s0, %s684_s14  ;;  %733 = vmatpush3.bf16.msra.mxu0 %v829_v3  ;;  %s848_s14 = sshll.u32 %s926_s13, 4  ;;  %s849_s14 = int_to_ptr.vmem [resolvable:$false] %s848_s14 }
  0x19   : > { %734 = vmatprep.subr.bf16.mxu0 %v924_v1  ;;  %v835_v15 = vld [vmem:[%s1027_s17] sm:$0xff]   ;;  %s268_s17 = sand.u32 1, %s906_s19   ;;  %s850_s15 = scalar_lea.vmem %s849_s14, 512 }
  0x1a   : > { %753 = vmatpush3.bf16.msra.mxu1 %v838_v8  ;;  %s682_s24 = sshll.u32 %s268_s17, 4  ;;  %s1084_s12 = scalar_lea.sflag [#allocation3], %s268_s17 }
  0x1b   : > { %754 = vmatprep.subr.bf16.mxu1 %v924_v1  ;;  %s270_s7 = scalar_lea.vmem [#allocation2], %s682_s24 }
  0x1c   : > { %735 = vmatpush3.bf16.msra.mxu0 %v830_v5  ;;  %s562_s8 = sshll.u32 %s270_s7, 4  ;;  %s1082_s8 = int_to_ptr.vmem [resolvable:$true] %s562_s8 }
  0x1d   : > { %736 = vmatprep.subr.bf16.mxu0 %v924_v1  ;;  %s844_s21 = scalar_lea.vmem %s1082_s8, 256  ;;  %p851_p1 = scmp.lt.s32.totalorder %s1082_s8, %s849_s14 }
  0x1e   : > { %755 = vmatpush3.bf16.msra.mxu1 %v839_v10  ;;  %p845_p12 = scmp.ne.s32.totalorder %s1082_s8, %s844_s21  ;;  %p852_p2 = scmp.lt.s32.totalorder %s850_s15, %s844_s21 }
  0x1f   : > { %756 = vmatprep.subr.bf16.mxu1 %v924_v1 }
  0x20   : > { %737 = vmatpush3.bf16.msra.mxu0 %v831_v7  ;;  %p846_p13 = pnand %p845_p12, %p999_p4  ;;  %p853_p3 = por %p852_p2, %p851_p1 }
  0x21   : > { %738 = vmatprep.subr.bf16.mxu0 %v924_v1 }
  0x22   : > { %757 = vmatpush3.bf16.msra.mxu1 %v840_v12  ;;  %p847_p0 = pneg %p846_p13 }
  0x23   : > { %758 = vmatprep.subr.bf16.mxu1 %v924_v1 }
  0x24   : > { %739 = vmatpush3.bf16.msra.mxu0 %v832_v9  ;;  %p854_p5 = pnand %p853_p3, %p847_p0 }
  0x25   : > { %740 = vmatprep.subr.bf16.mxu0 %v924_v1 }
  0x26   : > { %759 = vmatpush3.bf16.msra.mxu1 %v841_v14 }
  0x27   : > { %760 = vmatprep.subr.bf16.mxu1 %v924_v1 }
  0x28   : > { %741 = vmatpush3.bf16.msra.mxu0 %v833_v11 }
  0x29   : > { %742 = vmatprep.subr.bf16.mxu0 %v924_v1 }
  0x2a   : > { %761 = vmatpush3.bf16.msra.mxu1 %v842_v16 }
  0x2b   : > { %762 = vmatprep.subr.bf16.mxu1 %v924_v1 }
  0x2c   : > { %743 = vmatpush3.bf16.msra.mxu0 %v834_v13 }
  0x2e   : > { %763 = vmatpush3.bf16.msra.mxu1 %v843_v17 }
  0x2f   : > { %745 = vmatmul.mubr.bf16.vlgmr.msra.gmra.mrb[0].mxu0 %v835_v15 }
 0x102   : > { %v411_v19 = vpop.f32.mrb[0].mxu0 }
 0x103   : > { %v412_v20 = vadd.f32 %v685_v18, %v411_v19  ;;  %v746_v21 = vpop.f32.mrb[1].mxu0 }
 0x104   : > { %v414_v22 = vpop.f32.mrb[2].mxu0 }
 0x105   : > { %v415_v23 = vadd.f32 %v685_v18, %v414_v22  ;;  %v747_v24 = vpop.f32.mrb[3].mxu0  ;;  %v418_v25 = vmax.f32 %v412_v20, 0.0 }
 0x107   : > { %v419_v26 = vmax.f32 %v415_v23, 0.0 }
 0x109   : > { %v422_v27 = vpack.c.bf16 %v419_v26, %v418_v25 }
 0x10b   : > { %765 = vmatmul.mubr.bf16.vlgmr.msra.gmra.mrb[0].mxu1 %v422_v27 }
 0x1de   : > { %v521_v28 = vpop.f32.mrb[0].mxu1 }
 0x1df   : > { %v766_v30 = vpop.f32.mrb[1].mxu1  ;;  %v544_v32 = vadd.f32 %v703_v29, %v521_v28 }
 0x1e0   : > { %v524_v31 = vpop.f32.mrb[2].mxu1 }
 0x1e1   : > { %v767_v33 = vpop.f32.mrb[3].mxu1  ;;  %546 = vst [vmem:[%s270_s7] sm:$0xff] %v544_v32  ;;  %v545_v34 = vadd.f32 %v703_v29, %v524_v31 }
 0x1e3   : > { %547 = vst [vmem:[%s270_s7 + $0x8] sm:$0xff] %v545_v34 }
 0x1e4   : > { %857 = shalt.err (!%p854_p5)
}
 0x1e5   : > { %s858_s16 = scalar_lea.hbm %s1080_s11, 256  ;;  %s862_s25 = scalar_lea.hbm %s1135_s5, 512 }
 0x1e6   : > { %p859_p6 = scmp.ne.s32.totalorder %s1080_s11, %s858_s16  ;;  %p863_p10 = scmp.lt.u32.totalorder %s1080_s11, %s1135_s5 }
 0x1e7   : > { %p864_p11 = scmp.lt.u32.totalorder %s862_s25, %s858_s16  ;;  %p866_p13 = scmp.lt.u32.totalorder %s858_s16, %s1080_s11 }
 0x1e8   : > { %p860_p7 = pnand %p859_p6, %p999_p4 }
 0x1e9   : > { %p865_p12 = por %p864_p11, %p863_p10 }
 0x1ea   : > { %p861_p9 = pneg %p860_p7 }
 0x1eb   : > { %p867_p0 = por %p866_p13, %p865_p12 }
 0x1ed   : > { %p868_p1 = pnand %p867_p0, %p861_p9 }
 0x1ef   : > { %871 = shalt.err (!%p868_p1)
}
 0x1f0   : > { %s927_s7 = smov 128   ;;  %s928_s9 = smov 8  }
 0x1f1   : > { %768 = dma.vmem_to_hbm [thread:$0]  (%p999_p4), %s1082_s8, 256, %s1080_s11, %s1084_s12, %s927_s7, %s927_s7, %s928_s9  }
 0x1f2 PF: > { %p774_p2 = scmp.ge.s32.totalorder %s922_s23, 2  ;;  %s577_s10 = sand.u32 1, %s902_s18  }
 0x1f3   : > { %s578_s21 = scalar_lea.sflag [#allocation3], %s577_s10 }
 0x1f4   : > { %p771_p3 = pnand %p774_p2, %p1006_p8 }
 0x1f6   : > { %897 = dma.done.wait (!%p771_p3), %s578_s21, 256  }
 0x1f7   : > { %899 = vsyncadd (!%p771_p3), %s578_s21, 4294967040  ;;  %s18_s23 = sadd.s32 1, %s922_s23   ;;  %s1138_s18 = smov %s906_s19 }
 0x1f8   : > { %p15_p5 = scmp.ge.s32.totalorder %s18_s23, 4   ;;  %s1139_s19 = smov %s910_s20 }
 0x1f9   : > { %s1140_s20 = smov %s1012_s6  ;;  %s1141_s21 = smov %s918_s22 }
 0x1fa   : > { %s1142_s22 = smov %s1144_s26  ;;  %17 = sbr.rel (!%p15_p5) target bundleno = 4 (0x4), region = 92 }
 0x201   :  { %583 = vsyncpa [#allocation3], 1 }
 0x202   :  { %585 = vsyncpa [#allocation3 + $0x1], 1 }

</bundles_post_ra>
